<compile_context>
chip_gen: v6e
topology: v6e:2x2x1
jax: 0.10.0
libtpu: 0.0.40
codegen_flags: <defaults>
</compile_context>

<pallas_src>
import jax
import jax.numpy as jnp
from jax.experimental import pallas as pl
from jax.experimental.pallas import tpu as pltpu

# Problem sizes implied by BinarySegmentationModel(in_channels=3, out_channels=1)
B, C_IN, H, W = 2, 3, 16, 16
C_OUT = 1
K = 5
PAD = K // 2                      # 'same' padding for stride-1 5x5 conv
NTAPS = C_IN * K * K              # 75 conv taps
NPAIRS = (NTAPS + 1) // 2         # 38 tap-pairs (odd 76th tap zero-padded)
NPIX = B * H * W                  # 512 output pixels (C_OUT == 1)
LANES = 128
ROWS = NPIX // LANES              # 4 -> lane-dense output slab (4, 128)
SUB = 2 * ROWS                    # 8 sublanes -> one full (8,128) f32 vreg per pair
NACC = 4                          # independent accumulator chains


def _conv5x5_kernel(bias_ref, w_ref, x_ref, o_ref):
    """75-tap 'same' conv as 38 full-vreg FMAs on the VPU.

    bias_ref : SMEM (1,)             f32
    w_ref    : VMEM (NPAIRS, 8, 1)   f32  per-pair weights (tap 2p on sublanes
                                          0-3, tap 2p+1 on sublanes 4-7)
    x_ref    : VMEM (NPAIRS, 8, 128) f32  packed im2col tap-pairs (same layout)
    o_ref    : VMEM (4, 128)         f32  lane-dense output slab
    """
    zero = jnp.zeros((SUB, LANES), dtype=jnp.float32)
    accs = [zero, zero, zero, zero]
    # 4 independent accumulation chains (chunked unroll) instead of one
    # 75-deep serial mul+add dependency chain.
    bounds = [0, 10, 20, 29, NPAIRS]
    for a in range(NACC):
        acc = accs[a]
        for p in range(bounds[a], bounds[a + 1]):
            acc = acc + w_ref[p] * x_ref[p]        # (8,1)*(8,128) lane-broadcast FMA
        accs[a] = acc
    acc = (accs[0] + accs[1]) + (accs[2] + accs[3])   # (8, 128)
    # fold the packed halves: even taps (sublanes 0-3) + odd taps (sublanes 4-7)
    o_ref[...] = acc[0:ROWS, :] + acc[ROWS:SUB, :] + bias_ref[0]


@jax.jit
def binary_segmentation_forward(img, weight, bias):
    """img: (B, C_IN, H, W) f32; weight: (C_OUT, C_IN, K, K); bias: (C_OUT,)"""
    img = img.astype(jnp.float32)

    # --- layout plumbing (same jit; fuses into the Pallas input pipeline) ---
    x_pad = jnp.pad(img, ((0, 0), (0, 0), (PAD, PAD), (PAD, PAD)))
    taps = []
    for c in range(C_IN):
        for kh in range(K):
            for kw in range(K):
                taps.append(x_pad[:, c, kh:kh + H, kw:kw + W].reshape(ROWS, LANES))
    taps.append(jnp.zeros((ROWS, LANES), jnp.float32))          # pad 75 -> 76 taps
    # pair packing: tap 2p -> sublanes 0-3, tap 2p+1 -> sublanes 4-7
    patches = jnp.stack(taps, axis=0).reshape(NPAIRS, SUB, LANES)   # (38, 8, 128)

    # weights in (c, kh, kw) order (matches tap loop), zero-padded to 76,
    # packed per pair along sublanes; bias as an SMEM scalar.
    w_taps = jnp.concatenate(
        [weight[0].reshape(-1).astype(jnp.float32), jnp.zeros((1,), jnp.float32)]
    )                                                           # (76,)
    w_pairs = jnp.repeat(w_taps.reshape(NPAIRS, 2), ROWS, axis=1).reshape(
        NPAIRS, SUB, 1)                                         # (38, 8, 1)
    bias_sc = bias.reshape(1).astype(jnp.float32)               # (1,)

    out_flat = pl.pallas_call(
        _conv5x5_kernel,
        out_shape=jax.ShapeDtypeStruct((ROWS, LANES), jnp.float32),
        in_specs=[
            pl.BlockSpec(memory_space=pltpu.MemorySpace.SMEM),   # bias scalar
            pl.BlockSpec(memory_space=pltpu.MemorySpace.VMEM),   # pair weights
            pl.BlockSpec(memory_space=pltpu.MemorySpace.VMEM),   # im2col pairs
        ],
        out_specs=pl.BlockSpec(memory_space=pltpu.MemorySpace.VMEM),
        compiler_params=pltpu.CompilerParams(
            # let the im2col gather fuse into the Pallas input DMA instead of
            # round-tripping the 25x-expanded patches through HBM
            allow_input_fusion=[False, False, True],
        ),
    )(bias_sc, w_pairs, patches)

    # lane-dense slab back to NCHW
    return {"out": out_flat.reshape(B, C_OUT, H, W)}


if __name__ == "__main__":
    key = jax.random.PRNGKey(0)
    k_img, k_w, k_b = jax.random.split(key, 3)

    img = jax.random.normal(k_img, (B, C_IN, H, W), dtype=jnp.float32)
    # deterministic "init" of Conv2d(3, 1, 5) parameters
    weight = jax.random.normal(k_w, (C_OUT, C_IN, K, K), dtype=jnp.float32) * 0.1
    bias = jax.random.normal(k_b, (C_OUT,), dtype=jnp.float32) * 0.1

    out = binary_segmentation_forward(img, weight, bias)
    jax.block_until_ready(out["out"])

    # correctness check against XLA's conv (PyTorch NCHW / OIHW semantics)
    ref = jax.lax.conv_general_dilated(
        img, weight, window_strides=(1, 1), padding="SAME",
        dimension_numbers=("NCHW", "OIHW", "NCHW"),
    ) + bias.reshape(1, -1, 1, 1)
    assert out["out"].shape == (B, C_OUT, H, W)
    assert jnp.allclose(out["out"], ref, atol=1e-4, rtol=1e-4)

    print("KERNEL_OK")
</pallas_src>

<mosaic_0001>
module attributes {stable_mosaic.version = 11 : i64} {
  func.func @_conv5x5_kernel(%arg0: memref<1xf32, #tpu.memory_space<smem>>, %arg1: memref<38x8x1xf32, #tpu.memory_space<vmem>>, %arg2: memref<38x8x128xf32, #tpu.memory_space<vmem>>, %arg3: memref<4x128xf32, #tpu.memory_space<vmem>>) attributes {dimension_semantics = [], scalar_prefetch = 0 : i64, scratch_operands = 0 : i64, tpu.core_type = #tpu.core_type<tc>} {
    %cst = arith.constant 0.000000e+00 : f32
    %0 = vector.broadcast %cst : f32 to vector<8x128xf32>
    %c0 = arith.constant 0 : index
    %c0_0 = arith.constant 0 : index
    %c0_1 = arith.constant 0 : index
    %1 = vector.load %arg1[%c0, %c0_0, %c0_1] : memref<38x8x1xf32, #tpu.memory_space<vmem>>, vector<1x8x1xf32>
    %2 = vector.shape_cast %1 : vector<1x8x1xf32> to vector<8x1xf32>
    %c0_2 = arith.constant 0 : index
    %c0_3 = arith.constant 0 : index
    %c0_4 = arith.constant 0 : index
    %3 = vector.load %arg2[%c0_2, %c0_3, %c0_4] : memref<38x8x128xf32, #tpu.memory_space<vmem>>, vector<1x8x128xf32>
    %4 = vector.shape_cast %3 : vector<1x8x128xf32> to vector<8x128xf32>
    %5 = vector.broadcast %2 : vector<8x1xf32> to vector<8x128xf32>
    %6 = arith.mulf %5, %4 : vector<8x128xf32>
    %7 = arith.addf %0, %6 : vector<8x128xf32>
    %c1 = arith.constant 1 : index
    %c0_5 = arith.constant 0 : index
    %c0_6 = arith.constant 0 : index
    %8 = vector.load %arg1[%c1, %c0_5, %c0_6] : memref<38x8x1xf32, #tpu.memory_space<vmem>>, vector<1x8x1xf32>
    %9 = vector.shape_cast %8 : vector<1x8x1xf32> to vector<8x1xf32>
    %c1_7 = arith.constant 1 : index
    %c0_8 = arith.constant 0 : index
    %c0_9 = arith.constant 0 : index
    %10 = vector.load %arg2[%c1_7, %c0_8, %c0_9] : memref<38x8x128xf32, #tpu.memory_space<vmem>>, vector<1x8x128xf32>
    %11 = vector.shape_cast %10 : vector<1x8x128xf32> to vector<8x128xf32>
    %12 = vector.broadcast %9 : vector<8x1xf32> to vector<8x128xf32>
    %13 = arith.mulf %12, %11 : vector<8x128xf32>
    %14 = arith.addf %7, %13 : vector<8x128xf32>
    %c2 = arith.constant 2 : index
    %c0_10 = arith.constant 0 : index
    %c0_11 = arith.constant 0 : index
    %15 = vector.load %arg1[%c2, %c0_10, %c0_11] : memref<38x8x1xf32, #tpu.memory_space<vmem>>, vector<1x8x1xf32>
    %16 = vector.shape_cast %15 : vector<1x8x1xf32> to vector<8x1xf32>
    %c2_12 = arith.constant 2 : index
    %c0_13 = arith.constant 0 : index
    %c0_14 = arith.constant 0 : index
    %17 = vector.load %arg2[%c2_12, %c0_13, %c0_14] : memref<38x8x128xf32, #tpu.memory_space<vmem>>, vector<1x8x128xf32>
    %18 = vector.shape_cast %17 : vector<1x8x128xf32> to vector<8x128xf32>
    %19 = vector.broadcast %16 : vector<8x1xf32> to vector<8x128xf32>
    %20 = arith.mulf %19, %18 : vector<8x128xf32>
    %21 = arith.addf %14, %20 : vector<8x128xf32>
    %c3 = arith.constant 3 : index
    %c0_15 = arith.constant 0 : index
    %c0_16 = arith.constant 0 : index
    %22 = vector.load %arg1[%c3, %c0_15, %c0_16] : memref<38x8x1xf32, #tpu.memory_space<vmem>>, vector<1x8x1xf32>
    %23 = vector.shape_cast %22 : vector<1x8x1xf32> to vector<8x1xf32>
    %c3_17 = arith.constant 3 : index
    %c0_18 = arith.constant 0 : index
    %c0_19 = arith.constant 0 : index
    %24 = vector.load %arg2[%c3_17, %c0_18, %c0_19] : memref<38x8x128xf32, #tpu.memory_space<vmem>>, vector<1x8x128xf32>
    %25 = vector.shape_cast %24 : vector<1x8x128xf32> to vector<8x128xf32>
    %26 = vector.broadcast %23 : vector<8x1xf32> to vector<8x128xf32>
    %27 = arith.mulf %26, %25 : vector<8x128xf32>
    %28 = arith.addf %21, %27 : vector<8x128xf32>
    %c4 = arith.constant 4 : index
    %c0_20 = arith.constant 0 : index
    %c0_21 = arith.constant 0 : index
    %29 = vector.load %arg1[%c4, %c0_20, %c0_21] : memref<38x8x1xf32, #tpu.memory_space<vmem>>, vector<1x8x1xf32>
    %30 = vector.shape_cast %29 : vector<1x8x1xf32> to vector<8x1xf32>
    %c4_22 = arith.constant 4 : index
    %c0_23 = arith.constant 0 : index
    %c0_24 = arith.constant 0 : index
    %31 = vector.load %arg2[%c4_22, %c0_23, %c0_24] : memref<38x8x128xf32, #tpu.memory_space<vmem>>, vector<1x8x128xf32>
    %32 = vector.shape_cast %31 : vector<1x8x128xf32> to vector<8x128xf32>
    %33 = vector.broadcast %30 : vector<8x1xf32> to vector<8x128xf32>
    %34 = arith.mulf %33, %32 : vector<8x128xf32>
    %35 = arith.addf %28, %34 : vector<8x128xf32>
    %c5 = arith.constant 5 : index
    %c0_25 = arith.constant 0 : index
    %c0_26 = arith.constant 0 : index
    %36 = vector.load %arg1[%c5, %c0_25, %c0_26] : memref<38x8x1xf32, #tpu.memory_space<vmem>>, vector<1x8x1xf32>
    %37 = vector.shape_cast %36 : vector<1x8x1xf32> to vector<8x1xf32>
    %c5_27 = arith.constant 5 : index
    %c0_28 = arith.constant 0 : index
    %c0_29 = arith.constant 0 : index
    %38 = vector.load %arg2[%c5_27, %c0_28, %c0_29] : memref<38x8x128xf32, #tpu.memory_space<vmem>>, vector<1x8x128xf32>
    %39 = vector.shape_cast %38 : vector<1x8x128xf32> to vector<8x128xf32>
    %40 = vector.broadcast %37 : vector<8x1xf32> to vector<8x128xf32>
    %41 = arith.mulf %40, %39 : vector<8x128xf32>
    %42 = arith.addf %35, %41 : vector<8x128xf32>
    %c6 = arith.constant 6 : index
    %c0_30 = arith.constant 0 : index
    %c0_31 = arith.constant 0 : index
    %43 = vector.load %arg1[%c6, %c0_30, %c0_31] : memref<38x8x1xf32, #tpu.memory_space<vmem>>, vector<1x8x1xf32>
    %44 = vector.shape_cast %43 : vector<1x8x1xf32> to vector<8x1xf32>
    %c6_32 = arith.constant 6 : index
    %c0_33 = arith.constant 0 : index
    %c0_34 = arith.constant 0 : index
    %45 = vector.load %arg2[%c6_32, %c0_33, %c0_34] : memref<38x8x128xf32, #tpu.memory_space<vmem>>, vector<1x8x128xf32>
    %46 = vector.shape_cast %45 : vector<1x8x128xf32> to vector<8x128xf32>
    %47 = vector.broadcast %44 : vector<8x1xf32> to vector<8x128xf32>
    %48 = arith.mulf %47, %46 : vector<8x128xf32>
    %49 = arith.addf %42, %48 : vector<8x128xf32>
    %c7 = arith.constant 7 : index
    %c0_35 = arith.constant 0 : index
    %c0_36 = arith.constant 0 : index
    %50 = vector.load %arg1[%c7, %c0_35, %c0_36] : memref<38x8x1xf32, #tpu.memory_space<vmem>>, vector<1x8x1xf32>
    %51 = vector.shape_cast %50 : vector<1x8x1xf32> to vector<8x1xf32>
    %c7_37 = arith.constant 7 : index
    %c0_38 = arith.constant 0 : index
    %c0_39 = arith.constant 0 : index
    %52 = vector.load %arg2[%c7_37, %c0_38, %c0_39] : memref<38x8x128xf32, #tpu.memory_space<vmem>>, vector<1x8x128xf32>
    %53 = vector.shape_cast %52 : vector<1x8x128xf32> to vector<8x128xf32>
    %54 = vector.broadcast %51 : vector<8x1xf32> to vector<8x128xf32>
    %55 = arith.mulf %54, %53 : vector<8x128xf32>
    %56 = arith.addf %49, %55 : vector<8x128xf32>
    %c8 = arith.constant 8 : index
    %c0_40 = arith.constant 0 : index
    %c0_41 = arith.constant 0 : index
    %57 = vector.load %arg1[%c8, %c0_40, %c0_41] : memref<38x8x1xf32, #tpu.memory_space<vmem>>, vector<1x8x1xf32>
    %58 = vector.shape_cast %57 : vector<1x8x1xf32> to vector<8x1xf32>
    %c8_42 = arith.constant 8 : index
    %c0_43 = arith.constant 0 : index
    %c0_44 = arith.constant 0 : index
    %59 = vector.load %arg2[%c8_42, %c0_43, %c0_44] : memref<38x8x128xf32, #tpu.memory_space<vmem>>, vector<1x8x128xf32>
    %60 = vector.shape_cast %59 : vector<1x8x128xf32> to vector<8x128xf32>
    %61 = vector.broadcast %58 : vector<8x1xf32> to vector<8x128xf32>
    %62 = arith.mulf %61, %60 : vector<8x128xf32>
    %63 = arith.addf %56, %62 : vector<8x128xf32>
    %c9 = arith.constant 9 : index
    %c0_45 = arith.constant 0 : index
    %c0_46 = arith.constant 0 : index
    %64 = vector.load %arg1[%c9, %c0_45, %c0_46] : memref<38x8x1xf32, #tpu.memory_space<vmem>>, vector<1x8x1xf32>
    %65 = vector.shape_cast %64 : vector<1x8x1xf32> to vector<8x1xf32>
    %c9_47 = arith.constant 9 : index
    %c0_48 = arith.constant 0 : index
    %c0_49 = arith.constant 0 : index
    %66 = vector.load %arg2[%c9_47, %c0_48, %c0_49] : memref<38x8x128xf32, #tpu.memory_space<vmem>>, vector<1x8x128xf32>
    %67 = vector.shape_cast %66 : vector<1x8x128xf32> to vector<8x128xf32>
    %68 = vector.broadcast %65 : vector<8x1xf32> to vector<8x128xf32>
    %69 = arith.mulf %68, %67 : vector<8x128xf32>
    %70 = arith.addf %63, %69 : vector<8x128xf32>
    %c10 = arith.constant 10 : index
    %c0_50 = arith.constant 0 : index
    %c0_51 = arith.constant 0 : index
    %71 = vector.load %arg1[%c10, %c0_50, %c0_51] : memref<38x8x1xf32, #tpu.memory_space<vmem>>, vector<1x8x1xf32>
    %72 = vector.shape_cast %71 : vector<1x8x1xf32> to vector<8x1xf32>
    %c10_52 = arith.constant 10 : index
    %c0_53 = arith.constant 0 : index
    %c0_54 = arith.constant 0 : index
    %73 = vector.load %arg2[%c10_52, %c0_53, %c0_54] : memref<38x8x128xf32, #tpu.memory_space<vmem>>, vector<1x8x128xf32>
    %74 = vector.shape_cast %73 : vector<1x8x128xf32> to vector<8x128xf32>
    %75 = vector.broadcast %72 : vector<8x1xf32> to vector<8x128xf32>
    %76 = arith.mulf %75, %74 : vector<8x128xf32>
    %77 = arith.addf %0, %76 : vector<8x128xf32>
    %c11 = arith.constant 11 : index
    %c0_55 = arith.constant 0 : index
    %c0_56 = arith.constant 0 : index
    %78 = vector.load %arg1[%c11, %c0_55, %c0_56] : memref<38x8x1xf32, #tpu.memory_space<vmem>>, vector<1x8x1xf32>
    %79 = vector.shape_cast %78 : vector<1x8x1xf32> to vector<8x1xf32>
    %c11_57 = arith.constant 11 : index
    %c0_58 = arith.constant 0 : index
    %c0_59 = arith.constant 0 : index
    %80 = vector.load %arg2[%c11_57, %c0_58, %c0_59] : memref<38x8x128xf32, #tpu.memory_space<vmem>>, vector<1x8x128xf32>
    %81 = vector.shape_cast %80 : vector<1x8x128xf32> to vector<8x128xf32>
    %82 = vector.broadcast %79 : vector<8x1xf32> to vector<8x128xf32>
    %83 = arith.mulf %82, %81 : vector<8x128xf32>
    %84 = arith.addf %77, %83 : vector<8x128xf32>
    %c12 = arith.constant 12 : index
    %c0_60 = arith.constant 0 : index
    %c0_61 = arith.constant 0 : index
    %85 = vector.load %arg1[%c12, %c0_60, %c0_61] : memref<38x8x1xf32, #tpu.memory_space<vmem>>, vector<1x8x1xf32>
    %86 = vector.shape_cast %85 : vector<1x8x1xf32> to vector<8x1xf32>
    %c12_62 = arith.constant 12 : index
    %c0_63 = arith.constant 0 : index
    %c0_64 = arith.constant 0 : index
    %87 = vector.load %arg2[%c12_62, %c0_63, %c0_64] : memref<38x8x128xf32, #tpu.memory_space<vmem>>, vector<1x8x128xf32>
    %88 = vector.shape_cast %87 : vector<1x8x128xf32> to vector<8x128xf32>
    %89 = vector.broadcast %86 : vector<8x1xf32> to vector<8x128xf32>
    %90 = arith.mulf %89, %88 : vector<8x128xf32>
    %91 = arith.addf %84, %90 : vector<8x128xf32>
    %c13 = arith.constant 13 : index
    %c0_65 = arith.constant 0 : index
    %c0_66 = arith.constant 0 : index
    %92 = vector.load %arg1[%c13, %c0_65, %c0_66] : memref<38x8x1xf32, #tpu.memory_space<vmem>>, vector<1x8x1xf32>
    %93 = vector.shape_cast %92 : vector<1x8x1xf32> to vector<8x1xf32>
    %c13_67 = arith.constant 13 : index
    %c0_68 = arith.constant 0 : index
    %c0_69 = arith.constant 0 : index
    %94 = vector.load %arg2[%c13_67, %c0_68, %c0_69] : memref<38x8x128xf32, #tpu.memory_space<vmem>>, vector<1x8x128xf32>
    %95 = vector.shape_cast %94 : vector<1x8x128xf32> to vector<8x128xf32>
    %96 = vector.broadcast %93 : vector<8x1xf32> to vector<8x128xf32>
    %97 = arith.mulf %96, %95 : vector<8x128xf32>
    %98 = arith.addf %91, %97 : vector<8x128xf32>
    %c14 = arith.constant 14 : index
    %c0_70 = arith.constant 0 : index
    %c0_71 = arith.constant 0 : index
    %99 = vector.load %arg1[%c14, %c0_70, %c0_71] : memref<38x8x1xf32, #tpu.memory_space<vmem>>, vector<1x8x1xf32>
    %100 = vector.shape_cast %99 : vector<1x8x1xf32> to vector<8x1xf32>
    %c14_72 = arith.constant 14 : index
    %c0_73 = arith.constant 0 : index
    %c0_74 = arith.constant 0 : index
    %101 = vector.load %arg2[%c14_72, %c0_73, %c0_74] : memref<38x8x128xf32, #tpu.memory_space<vmem>>, vector<1x8x128xf32>
    %102 = vector.shape_cast %101 : vector<1x8x128xf32> to vector<8x128xf32>
    %103 = vector.broadcast %100 : vector<8x1xf32> to vector<8x128xf32>
    %104 = arith.mulf %103, %102 : vector<8x128xf32>
    %105 = arith.addf %98, %104 : vector<8x128xf32>
    %c15 = arith.constant 15 : index
    %c0_75 = arith.constant 0 : index
    %c0_76 = arith.constant 0 : index
    %106 = vector.load %arg1[%c15, %c0_75, %c0_76] : memref<38x8x1xf32, #tpu.memory_space<vmem>>, vector<1x8x1xf32>
    %107 = vector.shape_cast %106 : vector<1x8x1xf32> to vector<8x1xf32>
    %c15_77 = arith.constant 15 : index
    %c0_78 = arith.constant 0 : index
    %c0_79 = arith.constant 0 : index
    %108 = vector.load %arg2[%c15_77, %c0_78, %c0_79] : memref<38x8x128xf32, #tpu.memory_space<vmem>>, vector<1x8x128xf32>
    %109 = vector.shape_cast %108 : vector<1x8x128xf32> to vector<8x128xf32>
    %110 = vector.broadcast %107 : vector<8x1xf32> to vector<8x128xf32>
    %111 = arith.mulf %110, %109 : vector<8x128xf32>
    %112 = arith.addf %105, %111 : vector<8x128xf32>
    %c16 = arith.constant 16 : index
    %c0_80 = arith.constant 0 : index
    %c0_81 = arith.constant 0 : index
    %113 = vector.load %arg1[%c16, %c0_80, %c0_81] : memref<38x8x1xf32, #tpu.memory_space<vmem>>, vector<1x8x1xf32>
    %114 = vector.shape_cast %113 : vector<1x8x1xf32> to vector<8x1xf32>
    %c16_82 = arith.constant 16 : index
    %c0_83 = arith.constant 0 : index
    %c0_84 = arith.constant 0 : index
    %115 = vector.load %arg2[%c16_82, %c0_83, %c0_84] : memref<38x8x128xf32, #tpu.memory_space<vmem>>, vector<1x8x128xf32>
    %116 = vector.shape_cast %115 : vector<1x8x128xf32> to vector<8x128xf32>
    %117 = vector.broadcast %114 : vector<8x1xf32> to vector<8x128xf32>
    %118 = arith.mulf %117, %116 : vector<8x128xf32>
    %119 = arith.addf %112, %118 : vector<8x128xf32>
    %c17 = arith.constant 17 : index
    %c0_85 = arith.constant 0 : index
    %c0_86 = arith.constant 0 : index
    %120 = vector.load %arg1[%c17, %c0_85, %c0_86] : memref<38x8x1xf32, #tpu.memory_space<vmem>>, vector<1x8x1xf32>
    %121 = vector.shape_cast %120 : vector<1x8x1xf32> to vector<8x1xf32>
    %c17_87 = arith.constant 17 : index
    %c0_88 = arith.constant 0 : index
    %c0_89 = arith.constant 0 : index
    %122 = vector.load %arg2[%c17_87, %c0_88, %c0_89] : memref<38x8x128xf32, #tpu.memory_space<vmem>>, vector<1x8x128xf32>
    %123 = vector.shape_cast %122 : vector<1x8x128xf32> to vector<8x128xf32>
    %124 = vector.broadcast %121 : vector<8x1xf32> to vector<8x128xf32>
    %125 = arith.mulf %124, %123 : vector<8x128xf32>
    %126 = arith.addf %119, %125 : vector<8x128xf32>
    %c18 = arith.constant 18 : index
    %c0_90 = arith.constant 0 : index
    %c0_91 = arith.constant 0 : index
    %127 = vector.load %arg1[%c18, %c0_90, %c0_91] : memref<38x8x1xf32, #tpu.memory_space<vmem>>, vector<1x8x1xf32>
    %128 = vector.shape_cast %127 : vector<1x8x1xf32> to vector<8x1xf32>
    %c18_92 = arith.constant 18 : index
    %c0_93 = arith.constant 0 : index
    %c0_94 = arith.constant 0 : index
    %129 = vector.load %arg2[%c18_92, %c0_93, %c0_94] : memref<38x8x128xf32, #tpu.memory_space<vmem>>, vector<1x8x128xf32>
    %130 = vector.shape_cast %129 : vector<1x8x128xf32> to vector<8x128xf32>
    %131 = vector.broadcast %128 : vector<8x1xf32> to vector<8x128xf32>
    %132 = arith.mulf %131, %130 : vector<8x128xf32>
    %133 = arith.addf %126, %132 : vector<8x128xf32>
    %c19 = arith.constant 19 : index
    %c0_95 = arith.constant 0 : index
    %c0_96 = arith.constant 0 : index
    %134 = vector.load %arg1[%c19, %c0_95, %c0_96] : memref<38x8x1xf32, #tpu.memory_space<vmem>>, vector<1x8x1xf32>
    %135 = vector.shape_cast %134 : vector<1x8x1xf32> to vector<8x1xf32>
    %c19_97 = arith.constant 19 : index
    %c0_98 = arith.constant 0 : index
    %c0_99 = arith.constant 0 : index
    %136 = vector.load %arg2[%c19_97, %c0_98, %c0_99] : memref<38x8x128xf32, #tpu.memory_space<vmem>>, vector<1x8x128xf32>
    %137 = vector.shape_cast %136 : vector<1x8x128xf32> to vector<8x128xf32>
    %138 = vector.broadcast %135 : vector<8x1xf32> to vector<8x128xf32>
    %139 = arith.mulf %138, %137 : vector<8x128xf32>
    %140 = arith.addf %133, %139 : vector<8x128xf32>
    %c20 = arith.constant 20 : index
    %c0_100 = arith.constant 0 : index
    %c0_101 = arith.constant 0 : index
    %141 = vector.load %arg1[%c20, %c0_100, %c0_101] : memref<38x8x1xf32, #tpu.memory_space<vmem>>, vector<1x8x1xf32>
    %142 = vector.shape_cast %141 : vector<1x8x1xf32> to vector<8x1xf32>
    %c20_102 = arith.constant 20 : index
    %c0_103 = arith.constant 0 : index
    %c0_104 = arith.constant 0 : index
    %143 = vector.load %arg2[%c20_102, %c0_103, %c0_104] : memref<38x8x128xf32, #tpu.memory_space<vmem>>, vector<1x8x128xf32>
    %144 = vector.shape_cast %143 : vector<1x8x128xf32> to vector<8x128xf32>
    %145 = vector.broadcast %142 : vector<8x1xf32> to vector<8x128xf32>
    %146 = arith.mulf %145, %144 : vector<8x128xf32>
    %147 = arith.addf %0, %146 : vector<8x128xf32>
    %c21 = arith.constant 21 : index
    %c0_105 = arith.constant 0 : index
    %c0_106 = arith.constant 0 : index
    %148 = vector.load %arg1[%c21, %c0_105, %c0_106] : memref<38x8x1xf32, #tpu.memory_space<vmem>>, vector<1x8x1xf32>
    %149 = vector.shape_cast %148 : vector<1x8x1xf32> to vector<8x1xf32>
    %c21_107 = arith.constant 21 : index
    %c0_108 = arith.constant 0 : index
    %c0_109 = arith.constant 0 : index
    %150 = vector.load %arg2[%c21_107, %c0_108, %c0_109] : memref<38x8x128xf32, #tpu.memory_space<vmem>>, vector<1x8x128xf32>
    %151 = vector.shape_cast %150 : vector<1x8x128xf32> to vector<8x128xf32>
    %152 = vector.broadcast %149 : vector<8x1xf32> to vector<8x128xf32>
    %153 = arith.mulf %152, %151 : vector<8x128xf32>
    %154 = arith.addf %147, %153 : vector<8x128xf32>
    %c22 = arith.constant 22 : index
    %c0_110 = arith.constant 0 : index
    %c0_111 = arith.constant 0 : index
    %155 = vector.load %arg1[%c22, %c0_110, %c0_111] : memref<38x8x1xf32, #tpu.memory_space<vmem>>, vector<1x8x1xf32>
    %156 = vector.shape_cast %155 : vector<1x8x1xf32> to vector<8x1xf32>
    %c22_112 = arith.constant 22 : index
    %c0_113 = arith.constant 0 : index
    %c0_114 = arith.constant 0 : index
    %157 = vector.load %arg2[%c22_112, %c0_113, %c0_114] : memref<38x8x128xf32, #tpu.memory_space<vmem>>, vector<1x8x128xf32>
    %158 = vector.shape_cast %157 : vector<1x8x128xf32> to vector<8x128xf32>
    %159 = vector.broadcast %156 : vector<8x1xf32> to vector<8x128xf32>
    %160 = arith.mulf %159, %158 : vector<8x128xf32>
    %161 = arith.addf %154, %160 : vector<8x128xf32>
    %c23 = arith.constant 23 : index
    %c0_115 = arith.constant 0 : index
    %c0_116 = arith.constant 0 : index
    %162 = vector.load %arg1[%c23, %c0_115, %c0_116] : memref<38x8x1xf32, #tpu.memory_space<vmem>>, vector<1x8x1xf32>
    %163 = vector.shape_cast %162 : vector<1x8x1xf32> to vector<8x1xf32>
    %c23_117 = arith.constant 23 : index
    %c0_118 = arith.constant 0 : index
    %c0_119 = arith.constant 0 : index
    %164 = vector.load %arg2[%c23_117, %c0_118, %c0_119] : memref<38x8x128xf32, #tpu.memory_space<vmem>>, vector<1x8x128xf32>
    %165 = vector.shape_cast %164 : vector<1x8x128xf32> to vector<8x128xf32>
    %166 = vector.broadcast %163 : vector<8x1xf32> to vector<8x128xf32>
    %167 = arith.mulf %166, %165 : vector<8x128xf32>
    %168 = arith.addf %161, %167 : vector<8x128xf32>
    %c24 = arith.constant 24 : index
    %c0_120 = arith.constant 0 : index
    %c0_121 = arith.constant 0 : index
    %169 = vector.load %arg1[%c24, %c0_120, %c0_121] : memref<38x8x1xf32, #tpu.memory_space<vmem>>, vector<1x8x1xf32>
    %170 = vector.shape_cast %169 : vector<1x8x1xf32> to vector<8x1xf32>
    %c24_122 = arith.constant 24 : index
    %c0_123 = arith.constant 0 : index
    %c0_124 = arith.constant 0 : index
    %171 = vector.load %arg2[%c24_122, %c0_123, %c0_124] : memref<38x8x128xf32, #tpu.memory_space<vmem>>, vector<1x8x128xf32>
    %172 = vector.shape_cast %171 : vector<1x8x128xf32> to vector<8x128xf32>
    %173 = vector.broadcast %170 : vector<8x1xf32> to vector<8x128xf32>
    %174 = arith.mulf %173, %172 : vector<8x128xf32>
    %175 = arith.addf %168, %174 : vector<8x128xf32>
    %c25 = arith.constant 25 : index
    %c0_125 = arith.constant 0 : index
    %c0_126 = arith.constant 0 : index
    %176 = vector.load %arg1[%c25, %c0_125, %c0_126] : memref<38x8x1xf32, #tpu.memory_space<vmem>>, vector<1x8x1xf32>
    %177 = vector.shape_cast %176 : vector<1x8x1xf32> to vector<8x1xf32>
    %c25_127 = arith.constant 25 : index
    %c0_128 = arith.constant 0 : index
    %c0_129 = arith.constant 0 : index
    %178 = vector.load %arg2[%c25_127, %c0_128, %c0_129] : memref<38x8x128xf32, #tpu.memory_space<vmem>>, vector<1x8x128xf32>
    %179 = vector.shape_cast %178 : vector<1x8x128xf32> to vector<8x128xf32>
    %180 = vector.broadcast %177 : vector<8x1xf32> to vector<8x128xf32>
    %181 = arith.mulf %180, %179 : vector<8x128xf32>
    %182 = arith.addf %175, %181 : vector<8x128xf32>
    %c26 = arith.constant 26 : index
    %c0_130 = arith.constant 0 : index
    %c0_131 = arith.constant 0 : index
    %183 = vector.load %arg1[%c26, %c0_130, %c0_131] : memref<38x8x1xf32, #tpu.memory_space<vmem>>, vector<1x8x1xf32>
    %184 = vector.shape_cast %183 : vector<1x8x1xf32> to vector<8x1xf32>
    %c26_132 = arith.constant 26 : index
    %c0_133 = arith.constant 0 : index
    %c0_134 = arith.constant 0 : index
    %185 = vector.load %arg2[%c26_132, %c0_133, %c0_134] : memref<38x8x128xf32, #tpu.memory_space<vmem>>, vector<1x8x128xf32>
    %186 = vector.shape_cast %185 : vector<1x8x128xf32> to vector<8x128xf32>
    %187 = vector.broadcast %184 : vector<8x1xf32> to vector<8x128xf32>
    %188 = arith.mulf %187, %186 : vector<8x128xf32>
    %189 = arith.addf %182, %188 : vector<8x128xf32>
    %c27 = arith.constant 27 : index
    %c0_135 = arith.constant 0 : index
    %c0_136 = arith.constant 0 : index
    %190 = vector.load %arg1[%c27, %c0_135, %c0_136] : memref<38x8x1xf32, #tpu.memory_space<vmem>>, vector<1x8x1xf32>
    %191 = vector.shape_cast %190 : vector<1x8x1xf32> to vector<8x1xf32>
    %c27_137 = arith.constant 27 : index
    %c0_138 = arith.constant 0 : index
    %c0_139 = arith.constant 0 : index
    %192 = vector.load %arg2[%c27_137, %c0_138, %c0_139] : memref<38x8x128xf32, #tpu.memory_space<vmem>>, vector<1x8x128xf32>
    %193 = vector.shape_cast %192 : vector<1x8x128xf32> to vector<8x128xf32>
    %194 = vector.broadcast %191 : vector<8x1xf32> to vector<8x128xf32>
    %195 = arith.mulf %194, %193 : vector<8x128xf32>
    %196 = arith.addf %189, %195 : vector<8x128xf32>
    %c28 = arith.constant 28 : index
    %c0_140 = arith.constant 0 : index
    %c0_141 = arith.constant 0 : index
    %197 = vector.load %arg1[%c28, %c0_140, %c0_141] : memref<38x8x1xf32, #tpu.memory_space<vmem>>, vector<1x8x1xf32>
    %198 = vector.shape_cast %197 : vector<1x8x1xf32> to vector<8x1xf32>
    %c28_142 = arith.constant 28 : index
    %c0_143 = arith.constant 0 : index
    %c0_144 = arith.constant 0 : index
    %199 = vector.load %arg2[%c28_142, %c0_143, %c0_144] : memref<38x8x128xf32, #tpu.memory_space<vmem>>, vector<1x8x128xf32>
    %200 = vector.shape_cast %199 : vector<1x8x128xf32> to vector<8x128xf32>
    %201 = vector.broadcast %198 : vector<8x1xf32> to vector<8x128xf32>
    %202 = arith.mulf %201, %200 : vector<8x128xf32>
    %203 = arith.addf %196, %202 : vector<8x128xf32>
    %c29 = arith.constant 29 : index
    %c0_145 = arith.constant 0 : index
    %c0_146 = arith.constant 0 : index
    %204 = vector.load %arg1[%c29, %c0_145, %c0_146] : memref<38x8x1xf32, #tpu.memory_space<vmem>>, vector<1x8x1xf32>
    %205 = vector.shape_cast %204 : vector<1x8x1xf32> to vector<8x1xf32>
    %c29_147 = arith.constant 29 : index
    %c0_148 = arith.constant 0 : index
    %c0_149 = arith.constant 0 : index
    %206 = vector.load %arg2[%c29_147, %c0_148, %c0_149] : memref<38x8x128xf32, #tpu.memory_space<vmem>>, vector<1x8x128xf32>
    %207 = vector.shape_cast %206 : vector<1x8x128xf32> to vector<8x128xf32>
    %208 = vector.broadcast %205 : vector<8x1xf32> to vector<8x128xf32>
    %209 = arith.mulf %208, %207 : vector<8x128xf32>
    %210 = arith.addf %0, %209 : vector<8x128xf32>
    %c30 = arith.constant 30 : index
    %c0_150 = arith.constant 0 : index
    %c0_151 = arith.constant 0 : index
    %211 = vector.load %arg1[%c30, %c0_150, %c0_151] : memref<38x8x1xf32, #tpu.memory_space<vmem>>, vector<1x8x1xf32>
    %212 = vector.shape_cast %211 : vector<1x8x1xf32> to vector<8x1xf32>
    %c30_152 = arith.constant 30 : index
    %c0_153 = arith.constant 0 : index
    %c0_154 = arith.constant 0 : index
    %213 = vector.load %arg2[%c30_152, %c0_153, %c0_154] : memref<38x8x128xf32, #tpu.memory_space<vmem>>, vector<1x8x128xf32>
    %214 = vector.shape_cast %213 : vector<1x8x128xf32> to vector<8x128xf32>
    %215 = vector.broadcast %212 : vector<8x1xf32> to vector<8x128xf32>
    %216 = arith.mulf %215, %214 : vector<8x128xf32>
    %217 = arith.addf %210, %216 : vector<8x128xf32>
    %c31 = arith.constant 31 : index
    %c0_155 = arith.constant 0 : index
    %c0_156 = arith.constant 0 : index
    %218 = vector.load %arg1[%c31, %c0_155, %c0_156] : memref<38x8x1xf32, #tpu.memory_space<vmem>>, vector<1x8x1xf32>
    %219 = vector.shape_cast %218 : vector<1x8x1xf32> to vector<8x1xf32>
    %c31_157 = arith.constant 31 : index
    %c0_158 = arith.constant 0 : index
    %c0_159 = arith.constant 0 : index
    %220 = vector.load %arg2[%c31_157, %c0_158, %c0_159] : memref<38x8x128xf32, #tpu.memory_space<vmem>>, vector<1x8x128xf32>
    %221 = vector.shape_cast %220 : vector<1x8x128xf32> to vector<8x128xf32>
    %222 = vector.broadcast %219 : vector<8x1xf32> to vector<8x128xf32>
    %223 = arith.mulf %222, %221 : vector<8x128xf32>
    %224 = arith.addf %217, %223 : vector<8x128xf32>
    %c32 = arith.constant 32 : index
    %c0_160 = arith.constant 0 : index
    %c0_161 = arith.constant 0 : index
    %225 = vector.load %arg1[%c32, %c0_160, %c0_161] : memref<38x8x1xf32, #tpu.memory_space<vmem>>, vector<1x8x1xf32>
    %226 = vector.shape_cast %225 : vector<1x8x1xf32> to vector<8x1xf32>
    %c32_162 = arith.constant 32 : index
    %c0_163 = arith.constant 0 : index
    %c0_164 = arith.constant 0 : index
    %227 = vector.load %arg2[%c32_162, %c0_163, %c0_164] : memref<38x8x128xf32, #tpu.memory_space<vmem>>, vector<1x8x128xf32>
    %228 = vector.shape_cast %227 : vector<1x8x128xf32> to vector<8x128xf32>
    %229 = vector.broadcast %226 : vector<8x1xf32> to vector<8x128xf32>
    %230 = arith.mulf %229, %228 : vector<8x128xf32>
    %231 = arith.addf %224, %230 : vector<8x128xf32>
    %c33 = arith.constant 33 : index
    %c0_165 = arith.constant 0 : index
    %c0_166 = arith.constant 0 : index
    %232 = vector.load %arg1[%c33, %c0_165, %c0_166] : memref<38x8x1xf32, #tpu.memory_space<vmem>>, vector<1x8x1xf32>
    %233 = vector.shape_cast %232 : vector<1x8x1xf32> to vector<8x1xf32>
    %c33_167 = arith.constant 33 : index
    %c0_168 = arith.constant 0 : index
    %c0_169 = arith.constant 0 : index
    %234 = vector.load %arg2[%c33_167, %c0_168, %c0_169] : memref<38x8x128xf32, #tpu.memory_space<vmem>>, vector<1x8x128xf32>
    %235 = vector.shape_cast %234 : vector<1x8x128xf32> to vector<8x128xf32>
    %236 = vector.broadcast %233 : vector<8x1xf32> to vector<8x128xf32>
    %237 = arith.mulf %236, %235 : vector<8x128xf32>
    %238 = arith.addf %231, %237 : vector<8x128xf32>
    %c34 = arith.constant 34 : index
    %c0_170 = arith.constant 0 : index
    %c0_171 = arith.constant 0 : index
    %239 = vector.load %arg1[%c34, %c0_170, %c0_171] : memref<38x8x1xf32, #tpu.memory_space<vmem>>, vector<1x8x1xf32>
    %240 = vector.shape_cast %239 : vector<1x8x1xf32> to vector<8x1xf32>
    %c34_172 = arith.constant 34 : index
    %c0_173 = arith.constant 0 : index
    %c0_174 = arith.constant 0 : index
    %241 = vector.load %arg2[%c34_172, %c0_173, %c0_174] : memref<38x8x128xf32, #tpu.memory_space<vmem>>, vector<1x8x128xf32>
    %242 = vector.shape_cast %241 : vector<1x8x128xf32> to vector<8x128xf32>
    %243 = vector.broadcast %240 : vector<8x1xf32> to vector<8x128xf32>
    %244 = arith.mulf %243, %242 : vector<8x128xf32>
    %245 = arith.addf %238, %244 : vector<8x128xf32>
    %c35 = arith.constant 35 : index
    %c0_175 = arith.constant 0 : index
    %c0_176 = arith.constant 0 : index
    %246 = vector.load %arg1[%c35, %c0_175, %c0_176] : memref<38x8x1xf32, #tpu.memory_space<vmem>>, vector<1x8x1xf32>
    %247 = vector.shape_cast %246 : vector<1x8x1xf32> to vector<8x1xf32>
    %c35_177 = arith.constant 35 : index
    %c0_178 = arith.constant 0 : index
    %c0_179 = arith.constant 0 : index
    %248 = vector.load %arg2[%c35_177, %c0_178, %c0_179] : memref<38x8x128xf32, #tpu.memory_space<vmem>>, vector<1x8x128xf32>
    %249 = vector.shape_cast %248 : vector<1x8x128xf32> to vector<8x128xf32>
    %250 = vector.broadcast %247 : vector<8x1xf32> to vector<8x128xf32>
    %251 = arith.mulf %250, %249 : vector<8x128xf32>
    %252 = arith.addf %245, %251 : vector<8x128xf32>
    %c36 = arith.constant 36 : index
    %c0_180 = arith.constant 0 : index
    %c0_181 = arith.constant 0 : index
    %253 = vector.load %arg1[%c36, %c0_180, %c0_181] : memref<38x8x1xf32, #tpu.memory_space<vmem>>, vector<1x8x1xf32>
    %254 = vector.shape_cast %253 : vector<1x8x1xf32> to vector<8x1xf32>
    %c36_182 = arith.constant 36 : index
    %c0_183 = arith.constant 0 : index
    %c0_184 = arith.constant 0 : index
    %255 = vector.load %arg2[%c36_182, %c0_183, %c0_184] : memref<38x8x128xf32, #tpu.memory_space<vmem>>, vector<1x8x128xf32>
    %256 = vector.shape_cast %255 : vector<1x8x128xf32> to vector<8x128xf32>
    %257 = vector.broadcast %254 : vector<8x1xf32> to vector<8x128xf32>
    %258 = arith.mulf %257, %256 : vector<8x128xf32>
    %259 = arith.addf %252, %258 : vector<8x128xf32>
    %c37 = arith.constant 37 : index
    %c0_185 = arith.constant 0 : index
    %c0_186 = arith.constant 0 : index
    %260 = vector.load %arg1[%c37, %c0_185, %c0_186] : memref<38x8x1xf32, #tpu.memory_space<vmem>>, vector<1x8x1xf32>
    %261 = vector.shape_cast %260 : vector<1x8x1xf32> to vector<8x1xf32>
    %c37_187 = arith.constant 37 : index
    %c0_188 = arith.constant 0 : index
    %c0_189 = arith.constant 0 : index
    %262 = vector.load %arg2[%c37_187, %c0_188, %c0_189] : memref<38x8x128xf32, #tpu.memory_space<vmem>>, vector<1x8x128xf32>
    %263 = vector.shape_cast %262 : vector<1x8x128xf32> to vector<8x128xf32>
    %264 = vector.broadcast %261 : vector<8x1xf32> to vector<8x128xf32>
    %265 = arith.mulf %264, %263 : vector<8x128xf32>
    %266 = arith.addf %259, %265 : vector<8x128xf32>
    %267 = arith.addf %70, %140 : vector<8x128xf32>
    %268 = arith.addf %203, %266 : vector<8x128xf32>
    %269 = arith.addf %267, %268 : vector<8x128xf32>
    %270 = vector.extract_strided_slice %269 {offsets = [0, 0], sizes = [4, 128], strides = [1, 1]} : vector<8x128xf32> to vector<4x128xf32>
    %271 = vector.extract_strided_slice %269 {offsets = [4, 0], sizes = [4, 128], strides = [1, 1]} : vector<8x128xf32> to vector<4x128xf32>
    %272 = arith.addf %270, %271 : vector<4x128xf32>
    %c0_190 = arith.constant 0 : index
    %273 = memref.load %arg0[%c0_190] : memref<1xf32, #tpu.memory_space<smem>>
    %274 = vector.broadcast %273 : f32 to vector<4x128xf32>
    %275 = arith.addf %272, %274 : vector<4x128xf32>
    %c0_191 = arith.constant 0 : index
    %c0_192 = arith.constant 0 : index
    %276 = vector.load %arg3[%c0_191, %c0_192] : memref<4x128xf32, #tpu.memory_space<vmem>>, vector<4x128xf32>
    tpu.vector_store %arg3[%c0_191, %c0_192], %275 {strides = array<i32>} : memref<4x128xf32, #tpu.memory_space<vmem>>, vector<4x128xf32>,
    return
  }
}

</mosaic_0001>

<bundles_post_ra>
// kernel: squeeze.151
= control target key start
LH: loop header
LB: loop body
LE: loop exit
PB: predicated region body
PF: predicated region fallthrough
CT: control target
= control target key end

     0   :  { %s125_s10 = smov 70   ;;  %s126_s11 = smov 60   ;;  %vm3_vm0 = vcmask 39936   ;;  %vm9_vm1 = vcmask 613936   ;;  %vm15_vm2 = vcmask 572936   ;;  %vm21_vm3 = vcmask 531936   ;;  %s197_s0 = inlined_call_operand.vmem [shape: f32[3,5,5], index: 0, kind: input, shape index: {}]   ;;  %s198_s1 = inlined_call_operand.vmem [shape: f32[75], index: 1, kind: output, shape index: {}]  }
   0x1   :  { %v97_v0 = vld [vmem:[%s197_s0 + $0x14] sm:$0x1]   ;;  %v99_v1 = vld [vmem:[%s197_s0 + $0x12] sm:$0x1]   ;;  %v98_v2 = vld [vmem:[%s197_s0 + $0x13] sm:$0x1]  }
   0x2   :  { %7 = vrot.lane.b32.xlu0 %v97_v0, %s125_s10  ;;  %19 = vrot.lane.b32.xlu1 %v99_v1, %s126_s11  ;;  %v100_v3 = vld [vmem:[%s197_s0 + $0x11] sm:$0x1]   ;;  %s127_s16 = smov 65   ;;  %s128_s17 = smov 55   ;;  %v101_v4 = vld [vmem:[%s197_s0 + $0x10] sm:$0x1]  }
   0x3   :  { %v102_v5 = vld [vmem:[%s197_s0 + $0xc] sm:$0x1]   ;;  %v2_v6 = vld [vmem:[%s197_s0] sm:$0x1]   ;;  %s129_s24 = smov 50   ;;  %s130_s25 = smov 45  }
   0x4   :  { %4 = vst.msk [vmem:[#allocation0] sm:$0x1] %vm3_vm0, %v2_v6   ;;  %v103_v7 = vld [vmem:[%s197_s0 + $0xb] sm:$0x1]   ;;  %v104_v8 = vld [vmem:[%s197_s0 + $0xa] sm:$0x1]  }
   0x5   :  { %s131_s30 = smov 40   ;;  %s132_s2 = smov 35   ;;  %v105_v9 = vld [vmem:[%s197_s0 + $0x9] sm:$0x1]   ;;  %v106_v10 = vld [vmem:[%s197_s0 + $0x8] sm:$0x1]  }
   0x6   :  { %13 = vrot.lane.b32.xlu0 %v98_v2, %s127_s16  ;;  %25 = vrot.lane.b32.xlu1 %v100_v3, %s128_s17  ;;  %s133_s7 = smov 30   ;;  %s134_s8 = smov 25   ;;  %v107_v11 = vld [vmem:[%s197_s0 + $0x4] sm:$0x1]   ;;  %v108_v12 = vld [vmem:[%s197_s0 + $0x3] sm:$0x1]  }
   0x7   :  { %s135_s13 = smov 20   ;;  %s136_s14 = smov 15   ;;  %v109_v13 = vld [vmem:[%s197_s0 + $0x2] sm:$0x1]   ;;  %v110_v14 = vld [vmem:[%s197_s0 + $0x1] sm:$0x1]  }
   0x8   :  { %s137_s0 = smov 10   ;;  %s138_s19 = smov 5   ;;  %vm27_vm4 = vcmask 490936   ;;  %vm33_vm5 = vcmask 449936   ;;  %vm39_vm6 = vcmask 408936   ;;  %vm45_vm7 = vcmask 367936  }
   0x9   :  { %vm51_vm8 = vcmask 326936   ;;  %vm57_vm9 = vcmask 285936   ;;  %vm63_vm10 = vcmask 244936   ;;  %vm69_vm11 = vcmask 203936  }
   0xa   :  { %31 = vrot.lane.b32.xlu0 %v101_v4, %s129_s24  ;;  %37 = vrot.lane.b32.xlu1 %v102_v5, %s130_s25  ;;  %vm75_vm12 = vcmask 162936   ;;  %vm81_vm13 = vcmask 121936   ;;  %vm87_vm14 = vcmask 80936  }
   0xe   :  { %43 = vrot.lane.b32.xlu0 %v103_v7, %s131_s30  ;;  %49 = vrot.lane.b32.xlu1 %v104_v8, %s132_s2 }
  0x12   :  { %55 = vrot.lane.b32.xlu0 %v105_v9, %s133_s7  ;;  %61 = vrot.lane.b32.xlu1 %v106_v10, %s134_s8 }
  0x16   :  { %67 = vrot.lane.b32.xlu0 %v107_v11, %s135_s13  ;;  %73 = vrot.lane.b32.xlu1 %v108_v12, %s136_s14 }
  0x1a   :  { %79 = vrot.lane.b32.xlu0 %v109_v13, %s137_s0  ;;  %85 = vrot.lane.b32.xlu1 %v110_v14, %s138_s19 }
  0x74   :  { %v8_v15 = vpop.permute.xlu0 %7   ;;  %v20_v16 = vpop.permute.xlu1 %19  }
  0x75   :  { %10 = vst.msk [vmem:[#allocation0] sm:$0x1] %vm9_vm1, %v8_v15  }
  0x78   :  { %v14_v17 = vpop.permute.xlu0 %13   ;;  %v26_v18 = vpop.permute.xlu1 %25  }
  0x79   :  { %16 = vst.msk [vmem:[#allocation0] sm:$0x1] %vm15_vm2, %v14_v17  }
  0x7a   :  { %22 = vst.msk [vmem:[#allocation0] sm:$0x1] %vm21_vm3, %v20_v16  }
  0x7b   :  { %28 = vst.msk [vmem:[#allocation0] sm:$0x1] %vm27_vm4, %v26_v18  }
  0x7c   :  { %v32_v19 = vpop.permute.xlu0 %31   ;;  %v38_v20 = vpop.permute.xlu1 %37  }
  0x7d   :  { %34 = vst.msk [vmem:[#allocation0] sm:$0x1] %vm33_vm5, %v32_v19  }
  0x7e   :  { %40 = vst.msk [vmem:[#allocation0] sm:$0x1] %vm39_vm6, %v38_v20  }
  0x80   :  { %v44_v21 = vpop.permute.xlu0 %43   ;;  %v50_v22 = vpop.permute.xlu1 %49  }
  0x81   :  { %46 = vst.msk [vmem:[#allocation0] sm:$0x1] %vm45_vm7, %v44_v21  }
  0x82   :  { %52 = vst.msk [vmem:[#allocation0] sm:$0x1] %vm51_vm8, %v50_v22  }
  0x84   :  { %v56_v23 = vpop.permute.xlu0 %55   ;;  %v62_v24 = vpop.permute.xlu1 %61  }
  0x85   :  { %58 = vst.msk [vmem:[#allocation0] sm:$0x1] %vm57_vm9, %v56_v23  }
  0x86   :  { %64 = vst.msk [vmem:[#allocation0] sm:$0x1] %vm63_vm10, %v62_v24  }
  0x88   :  { %v68_v25 = vpop.permute.xlu0 %67   ;;  %v74_v26 = vpop.permute.xlu1 %73  }
  0x89   :  { %70 = vst.msk [vmem:[#allocation0] sm:$0x1] %vm69_vm11, %v68_v25  }
  0x8a   :  { %76 = vst.msk [vmem:[#allocation0] sm:$0x1] %vm75_vm12, %v74_v26  }
  0x8c   :  { %v80_v27 = vpop.permute.xlu0 %79   ;;  %v86_v28 = vpop.permute.xlu1 %85  }
  0x8d   :  { %82 = vst.msk [vmem:[#allocation0] sm:$0x1] %vm81_vm13, %v80_v27  }
  0x8e   :  { %88 = vst.msk [vmem:[#allocation0] sm:$0x1] %vm87_vm14, %v86_v28  }
  0x95   :  { %v93_v29 = vld [vmem:[#allocation0] sm:$0x1] }
  0x96   :  { %96 = vst [vmem:[%s198_s1] sm:$0x1] %v93_v29 }

// kernel: squeeze.147
= control target key start
LH: loop header
LB: loop body
LE: loop exit
PB: predicated region body
PF: predicated region fallthrough
CT: control target
= control target key end

     0   :  { %s69_s8 = smov 112   ;;  %s70_s11 = smov 80   ;;  %vm3_vm0 = vcmask 130048   ;;  %vm9_vm1 = vcmask 1048448   ;;  %vm15_vm2 = vcmask 917248   ;;  %vm21_vm3 = vcmask 786048   ;;  %s113_s0 = inlined_call_operand.vmem [shape: f32[2,1,16,16], index: 0, kind: input, shape index: {}]   ;;  %s114_s1 = inlined_call_operand.vmem [shape: f32[1,4,128], index: 1, kind: output, shape index: {}]  }
   0x1   :  { %v55_v0 = vld [vmem:[%s113_s0 + $0x7] ss:$8 sm:$0xf]   ;;  %v57_v1 = vld [vmem:[%s113_s0 + $0x5] ss:$8 sm:$0xf]  }
   0x2   :  { %7 = vrot.lane.b32.xlu0 %v55_v0, %s69_s8  ;;  %19 = vrot.lane.b32.xlu1 %v57_v1, %s70_s11  ;;  %v56_v2 = vld [vmem:[%s113_s0 + $0x6] ss:$8 sm:$0xf]   ;;  %v58_v3 = vld [vmem:[%s113_s0 + $0x4] ss:$8 sm:$0xf]  }
   0x3   :  { %s71_s16 = smov 96   ;;  %v2_v4 = vld [vmem:[%s113_s0] ss:$8 sm:$0xf]   ;;  %s72_s19 = smov 64   ;;  %vm27_vm4 = vcmask 654848  }
   0x4   :  { %v59_v5 = vld [vmem:[%s113_s0 + $0x3] ss:$8 sm:$0xf]   ;;  %4 = vst.msk [vmem:[#allocation0] sm:$0xf] %vm3_vm0, %v2_v4   ;;  %s73_s24 = smov 48  }
   0x5   :  { %v60_v6 = vld [vmem:[%s113_s0 + $0x2] ss:$8 sm:$0xf]   ;;  %s74_s25 = smov 32   ;;  %vm33_vm5 = vcmask 523648   ;;  %vm39_vm6 = vcmask 392448  }
   0x6   :  { %13 = vrot.lane.b32.xlu0 %v56_v2, %s71_s16  ;;  %25 = vrot.lane.b32.xlu1 %v58_v3, %s72_s19  ;;  %v61_v7 = vld [vmem:[%s113_s0 + $0x1] ss:$8 sm:$0xf]   ;;  %s75_s0 = smov 16   ;;  %vm45_vm7 = vcmask 261248  }
   0xa   :  { %31 = vrot.lane.b32.xlu0 %v59_v5, %s73_s24  ;;  %37 = vrot.lane.b32.xlu1 %v60_v6, %s74_s25 }
   0xe   :  { %43 = vrot.lane.b32.xlu0 %v61_v7, %s75_s0 }
  0x74   :  { %v8_v8 = vpop.permute.xlu0 %7   ;;  %v20_v9 = vpop.permute.xlu1 %19  }
  0x75   :  { %10 = vst.msk [vmem:[#allocation0] sm:$0xf] %vm9_vm1, %v8_v8  }
  0x78   :  { %v14_v10 = vpop.permute.xlu0 %13   ;;  %v26_v11 = vpop.permute.xlu1 %25  }
  0x79   :  { %16 = vst.msk [vmem:[#allocation0] sm:$0xf] %vm15_vm2, %v14_v10  }
  0x7a   :  { %22 = vst.msk [vmem:[#allocation0] sm:$0xf] %vm21_vm3, %v20_v9  }
  0x7b   :  { %28 = vst.msk [vmem:[#allocation0] sm:$0xf] %vm27_vm4, %v26_v11  }
  0x7c   :  { %v32_v12 = vpop.permute.xlu0 %31   ;;  %v38_v13 = vpop.permute.xlu1 %37  }
  0x7d   :  { %34 = vst.msk [vmem:[#allocation0] sm:$0xf] %vm33_vm5, %v32_v12  }
  0x7e   :  { %40 = vst.msk [vmem:[#allocation0] sm:$0xf] %vm39_vm6, %v38_v13  }
  0x80   :  { %v44_v14 = vpop.permute.xlu0 %43  }
  0x81   :  { %46 = vst.msk [vmem:[#allocation0] sm:$0xf] %vm45_vm7, %v44_v14  }
  0x88   :  { %v51_v15 = vld [vmem:[#allocation0] sm:$0xf] }
  0x89   :  { %54 = vst [vmem:[%s114_s1] sm:$0xf] %v51_v15 }

// kernel: binary_segmentation_forward.2
= control target key start
LH: loop header
LB: loop body
LE: loop exit
PB: predicated region body
PF: predicated region fallthrough
CT: control target
= control target key end

     0   :  { %v523_v0 = vmov 0   ;;  %s793_s1 = inlined_call_operand.vmem [shape: f32[38,8,1], index: 1, kind: input, shape index: {}]   ;;  %s794_s2 = inlined_call_operand.vmem [shape: f32[38,8,128], index: 2, kind: input, shape index: {}]   ;;  %s795_s0 = inlined_call_operand.<no memory space> [shape: f32[1], index: 0, kind: input, shape index: {}]   ;;  %s796_s3 = inlined_call_operand.vmem [shape: f32[4,128], index: 3, kind: output, shape index: {}]  }
   0x1   :  { %522 = vset.pattern.permute.xlu1 %v523_v0  ;;  %521 = vset.pattern.permute.xlu0 %v523_v0  ;;  %v448_v1 = vld [vmem:[%s793_s1 + $0x10] sm:$0xff]  ;;  %v15_v2 = vld [vmem:[%s793_s1] sm:$0xff]  ;;  %v450_v3 = vld [vmem:[%s793_s1 + $0x18] sm:$0xff] }
   0x2   :  { %41 = vperm.xlu1 %522, %v448_v1   ;;  %19 = vperm.xlu0 %521, %v15_v2   ;;  %v446_v4 = vld [vmem:[%s793_s1 + $0x8] sm:$0xff]  ;;  %v452_v6 = vld [vmem:[%s793_s1 + $0x20] sm:$0xff]  ;;  %v458_v7 = vld [vmem:[%s793_s1 + $0x38] sm:$0xff] }
   0x3   :  { %v454_v5 = vld [vmem:[%s793_s1 + $0x28] sm:$0xff]  ;;  %v456_v8 = vld [vmem:[%s793_s1 + $0x30] sm:$0xff]  ;;  %v460_v10 = vld [vmem:[%s793_s1 + $0x40] sm:$0xff] }
   0x4   :  { %v462_v9 = vld [vmem:[%s793_s1 + $0x48] sm:$0xff]  ;;  %v466_v11 = vld [vmem:[%s793_s1 + $0x58] sm:$0xff]  ;;  %v464_v12 = vld [vmem:[%s793_s1 + $0x50] sm:$0xff] }
   0x5   :  { %v470_v13 = vld [vmem:[%s793_s1 + $0x68] sm:$0xff]  ;;  %v468_v14 = vld [vmem:[%s793_s1 + $0x60] sm:$0xff]  ;;  %v474_v15 = vld [vmem:[%s793_s1 + $0x78] sm:$0xff] }
   0x6   :  { %52 = vperm.xlu1 %522, %v450_v3   ;;  %30 = vperm.xlu0 %521, %v446_v4   ;;  %v472_v16 = vld [vmem:[%s793_s1 + $0x70] sm:$0xff]  ;;  %v486_v17 = vld [vmem:[%s793_s1 + $0xa8] sm:$0xff]  ;;  %v484_v18 = vld [vmem:[%s793_s1 + $0xa0] sm:$0xff] }
   0x7   :  { %v504_v19 = vld [vmem:[%s793_s1 + $0xf0] sm:$0xff]  ;;  %v502_v20 = vld [vmem:[%s793_s1 + $0xe8] sm:$0xff]  ;;  %v506_v21 = vld [vmem:[%s793_s1 + $0xf8] sm:$0xff] }
   0x8   :  { %v488_v22 = vld [vmem:[%s793_s1 + $0xb0] sm:$0xff]  ;;  %v508_v23 = vld [vmem:[%s793_s1 + $0x100] sm:$0xff]  ;;  %v490_v24 = vld [vmem:[%s793_s1 + $0xb8] sm:$0xff] }
   0x9   :  { %v510_v25 = vld [vmem:[%s793_s1 + $0x108] sm:$0xff]  ;;  %v492_v26 = vld [vmem:[%s793_s1 + $0xc0] sm:$0xff]  ;;  %v512_v30 = vld [vmem:[%s793_s1 + $0x110] sm:$0xff] }
   0xa   :  { %74 = vperm.xlu1 %522, %v454_v5   ;;  %63 = vperm.xlu0 %521, %v452_v6   ;;  %v494_v27 = vld [vmem:[%s793_s1 + $0xc8] sm:$0xff]  ;;  %v476_v28 = vld [vmem:[%s793_s1 + $0x80] sm:$0xff]  ;;  %v514_v31 = vld [vmem:[%s793_s1 + $0x118] sm:$0xff] }
   0xb   :  { %v478_v29 = vld [vmem:[%s793_s1 + $0x88] sm:$0xff]  ;;  %v496_v32 = vld [vmem:[%s793_s1 + $0xd0] sm:$0xff]  ;;  %v498_v33 = vld [vmem:[%s793_s1 + $0xd8] sm:$0xff] }
   0xc   :  { %v480_v34 = vld [vmem:[%s793_s1 + $0x90] sm:$0xff]  ;;  %v482_v35 = vld [vmem:[%s793_s1 + $0x98] sm:$0xff]  ;;  %v516_v36 = vld [vmem:[%s793_s1 + $0x120] sm:$0xff] }
   0xd   :  { %v518_v37 = vld [vmem:[%s793_s1 + $0x128] sm:$0xff]  ;;  %v500_v38 = vld [vmem:[%s793_s1 + $0xe0] sm:$0xff]  ;;  %v449_v1 = vld [vmem:[%s794_s2 + $0x10] sm:$0xff] }
   0xe   :  { %96 = vperm.xlu1 %522, %v458_v7   ;;  %85 = vperm.xlu0 %521, %v456_v8   ;;  %v447_v57 = vld [vmem:[%s794_s2 + $0x8] sm:$0xff]  ;;  %v16_v60 = vld [vmem:[%s794_s2] sm:$0xff]  ;;  %v467_v4 = vld [vmem:[%s794_s2 + $0x58] sm:$0xff] }
   0xf   :  { %v465_v5 = vld [vmem:[%s794_s2 + $0x50] sm:$0xff]  ;;  %v451_v8 = vld [vmem:[%s794_s2 + $0x18] sm:$0xff] }
  0x12   :  { %118 = vperm.xlu1 %522, %v462_v9   ;;  %107 = vperm.xlu0 %521, %v460_v10   ;;  %v469_v10 = vld [vmem:[%s794_s2 + $0x60] sm:$0xff] }
  0x16   :  { %140 = vperm.xlu1 %522, %v466_v11   ;;  %129 = vperm.xlu0 %521, %v464_v12  }
  0x1a   :  { %162 = vperm.xlu1 %522, %v470_v13   ;;  %151 = vperm.xlu0 %521, %v468_v14  }
  0x1e   :  { %184 = vperm.xlu1 %522, %v474_v15   ;;  %173 = vperm.xlu0 %521, %v472_v16   ;;  %v453_v16 = vld [vmem:[%s794_s2 + $0x20] sm:$0xff] }
  0x22   :  { %250 = vperm.xlu1 %522, %v486_v17   ;;  %239 = vperm.xlu0 %521, %v484_v18  }
  0x26   :  { %349 = vperm.xlu1 %522, %v504_v19   ;;  %338 = vperm.xlu0 %521, %v502_v20  }
  0x2a   :  { %360 = vperm.xlu1 %522, %v506_v21   ;;  %261 = vperm.xlu0 %521, %v488_v22   ;;  %v471_v21 = vld [vmem:[%s794_s2 + $0x68] sm:$0xff] }
  0x2e   :  { %371 = vperm.xlu1 %522, %v508_v23   ;;  %272 = vperm.xlu0 %521, %v490_v24   ;;  %v455_v24 = vld [vmem:[%s794_s2 + $0x28] sm:$0xff] }
  0x32   :  { %382 = vperm.xlu1 %522, %v510_v25   ;;  %283 = vperm.xlu0 %521, %v492_v26   ;;  %v487_v26 = vld [vmem:[%s794_s2 + $0xa8] sm:$0xff] }
  0x36   :  { %294 = vperm.xlu1 %522, %v494_v27   ;;  %195 = vperm.xlu0 %521, %v476_v28   ;;  %v485_v27 = vld [vmem:[%s794_s2 + $0xa0] sm:$0xff] }
  0x3a   :  { %206 = vperm.xlu1 %522, %v478_v29   ;;  %393 = vperm.xlu0 %521, %v512_v30   ;;  %v473_v29 = vld [vmem:[%s794_s2 + $0x70] sm:$0xff] }
  0x3b   :  { %v505_v30 = vld [vmem:[%s794_s2 + $0xf0] sm:$0xff] }
  0x3e   :  { %404 = vperm.xlu1 %522, %v514_v31   ;;  %305 = vperm.xlu0 %521, %v496_v32   ;;  %v503_v31 = vld [vmem:[%s794_s2 + $0xe8] sm:$0xff] }
  0x42   :  { %316 = vperm.xlu1 %522, %v498_v33   ;;  %217 = vperm.xlu0 %521, %v480_v34   ;;  %v489_v33 = vld [vmem:[%s794_s2 + $0xb0] sm:$0xff] }
  0x46   :  { %228 = vperm.xlu1 %522, %v482_v35   ;;  %415 = vperm.xlu0 %521, %v516_v36  }
  0x4a   :  { %426 = vperm.xlu1 %522, %v518_v37   ;;  %327 = vperm.xlu0 %521, %v500_v38   ;;  %v507_v37 = vld [vmem:[%s794_s2 + $0xf8] sm:$0xff] }
  0x7d   :  { %v42_v39 = vpop.permute.xlu1 %41  ;;  %v20_v40 = vpop.permute.xlu0 %19 }
  0x7e   :  { %v22_v62 = vmul.f32 %v20_v40, %v16_v60  ;;  %v44_v3 = vmul.f32 %v449_v1, %v42_v39  ;;  %v457_v40 = vld [vmem:[%s794_s2 + $0x30] sm:$0xff]  ;;  %v511_v60 = vld [vmem:[%s794_s2 + $0x108] sm:$0xff] }
  0x81   :  { %v53_v41 = vpop.permute.xlu1 %52  ;;  %v31_v42 = vpop.permute.xlu0 %30 }
  0x82   :  { %v33_v61 = vmul.f32 %v447_v57, %v31_v42  ;;  %v55_v13 = vmul.f32 %v451_v8, %v53_v41  ;;  %v479_v8 = vld [vmem:[%s794_s2 + $0x88] sm:$0xff] }
  0x84   :  { %v34_v2 = vadd.f32 %v33_v61, %v22_v62  ;;  %v477_v61 = vld [vmem:[%s794_s2 + $0x80] sm:$0xff] }
  0x85   :  { %v75_v43 = vpop.permute.xlu1 %74  ;;  %v64_v44 = vpop.permute.xlu0 %63 }
  0x86   :  { %v45_v9 = vadd.f32 %v44_v3, %v34_v2  ;;  %v66_v20 = vmul.f32 %v453_v16, %v64_v44  ;;  %v77_v34 = vmul.f32 %v455_v24, %v75_v43  ;;  %v491_v43 = vld [vmem:[%s794_s2 + $0xb8] sm:$0xff]  ;;  %v495_v3 = vld [vmem:[%s794_s2 + $0xc8] sm:$0xff] }
  0x88   :  { %v56_v18 = vadd.f32 %v55_v13, %v45_v9  ;;  %v513_v9 = vld [vmem:[%s794_s2 + $0x110] sm:$0xff] }
  0x89   :  { %v658_v45 = vpop.permute.xlu1 %96  ;;  %v660_v46 = vpop.permute.xlu0 %85  ;;  %v497_v13 = vld [vmem:[%s794_s2 + $0xd0] sm:$0xff] }
  0x8a   :  { %v67_v28 = vadd.f32 %v66_v20, %v56_v18  ;;  %v88_v57 = vmul.f32 %v457_v40, %v660_v46  ;;  %v459_v46 = vld [vmem:[%s794_s2 + $0x38] sm:$0xff] }
  0x8b   :  { %v99_v16 = vmul.f32 %v459_v46, %v658_v45  ;;  %v515_v18 = vld [vmem:[%s794_s2 + $0x118] sm:$0xff] }
  0x8d   :  { %v662_v47 = vpop.permute.xlu1 %118  ;;  %v664_v48 = vpop.permute.xlu0 %107 }
  0x91   :  { %v141_v49 = vpop.permute.xlu1 %140  ;;  %v130_v50 = vpop.permute.xlu0 %129 }
  0x92   :  { %v143_v11 = vmul.f32 %v467_v4, %v141_v49  ;;  %v132_v12 = vmul.f32 %v465_v5, %v130_v50  ;;  %v78_v50 = vadd.f32 %v77_v34, %v67_v28  ;;  %v483_v28 = vld [vmem:[%s794_s2 + $0x98] sm:$0xff] }
  0x94   :  { %v144_v19 = vadd.f32 %v143_v11, %v132_v12  ;;  %v89_v4 = vadd.f32 %v88_v57, %v78_v50 }
  0x95   :  { %v163_v51 = vpop.permute.xlu1 %162  ;;  %v152_v52 = vpop.permute.xlu0 %151 }
  0x96   :  { %v154_v17 = vmul.f32 %v469_v10, %v152_v52  ;;  %v165_v32 = vmul.f32 %v471_v21, %v163_v51  ;;  %v509_v52 = vld [vmem:[%s794_s2 + $0x100] sm:$0xff] }
  0x98   :  { %v155_v25 = vadd.f32 %v154_v17, %v144_v19 }
  0x99   :  { %v666_v53 = vpop.permute.xlu1 %184  ;;  %v174_v54 = vpop.permute.xlu0 %173 }
  0x9a   :  { %v166_v41 = vadd.f32 %v165_v32, %v155_v25  ;;  %v176_v42 = vmul.f32 %v473_v29, %v174_v54  ;;  %v475_v54 = vld [vmem:[%s794_s2 + $0x78] sm:$0xff]  ;;  %v100_v25 = vadd.f32 %v99_v16, %v89_v4  ;;  %v517_v29 = vld [vmem:[%s794_s2 + $0x120] sm:$0xff]  ;;  %v439_v4 = vstv %s795_s0 }
  0x9b   :  { %v187_v10 = vmul.f32 %v475_v54, %v666_v53  ;;  %v481_v53 = vld [vmem:[%s794_s2 + $0x90] sm:$0xff] }
  0x9d   :  { %v251_v55 = vpop.permute.xlu1 %250  ;;  %v240_v56 = vpop.permute.xlu0 %239 }
  0x9e   :  { %v253_v35 = vmul.f32 %v487_v26, %v251_v55  ;;  %v242_v36 = vmul.f32 %v485_v27, %v240_v56  ;;  %v493_v56 = vld [vmem:[%s794_s2 + $0xc0] sm:$0xff] }
  0xa1   :  { %v350_v58 = vpop.permute.xlu1 %349  ;;  %v339_v59 = vpop.permute.xlu0 %338 }
  0xa2   :  { %v352_v44 = vmul.f32 %v505_v30, %v350_v58  ;;  %v341_v49 = vmul.f32 %v503_v31, %v339_v59  ;;  %v254_v58 = vadd.f32 %v253_v35, %v242_v36 }
  0xa4   :  { %v353_v1 = vadd.f32 %v352_v44, %v341_v49 }
  0xa5   :  { %v361_v63 = vpop.permute.xlu1 %360  ;;  %v262_v0 = vpop.permute.xlu0 %261 }
  0xa6   :  { %v264_v51 = vmul.f32 %v489_v33, %v262_v0  ;;  %v363_v55 = vmul.f32 %v507_v37, %v361_v63  ;;  %v177_v0 = vadd.f32 %v176_v42, %v166_v41 }
  0xa8   :  { %v265_v5 = vadd.f32 %v264_v51, %v254_v58  ;;  %v364_v11 = vadd.f32 %v363_v55, %v353_v1 }
  0xa9   :  { %v372_v6 = vpop.permute.xlu1 %371  ;;  %v273_v7 = vpop.permute.xlu0 %272 }
  0xaa   :  { %v275_v59 = vmul.f32 %v491_v43, %v273_v7  ;;  %v374_v2 = vmul.f32 %v509_v52, %v372_v6  ;;  %v519_v43 = vld [vmem:[%s794_s2 + $0x128] sm:$0xff] }
  0xac   :  { %v375_v21 = vadd.f32 %v374_v2, %v364_v11 }
  0xad   :  { %v383_v14 = vpop.permute.xlu1 %382  ;;  %v284_v15 = vpop.permute.xlu0 %283 }
  0xae   :  { %v286_v7 = vmul.f32 %v493_v56, %v284_v15  ;;  %v385_v12 = vmul.f32 %v511_v60, %v383_v14  ;;  %v276_v15 = vadd.f32 %v275_v59, %v265_v5  ;;  %v461_v14 = vld [vmem:[%s794_s2 + $0x40] sm:$0xff] }
  0xaf   :  { %v110_v34 = vmul.f32 %v461_v14, %v664_v48  ;;  %v501_v48 = vld [vmem:[%s794_s2 + $0xe0] sm:$0xff] }
  0xb0   :  { %v287_v26 = vadd.f32 %v286_v7, %v276_v15  ;;  %v386_v30 = vadd.f32 %v385_v12, %v375_v21 }
  0xb1   :  { %v295_v22 = vpop.permute.xlu1 %294  ;;  %v196_v23 = vpop.permute.xlu0 %195  ;;  %v111_v50 = vadd.f32 %v110_v34, %v100_v25 }
  0xb2   :  { %v198_v6 = vmul.f32 %v477_v61, %v196_v23  ;;  %v297_v17 = vmul.f32 %v495_v3, %v295_v22  ;;  %v188_v23 = vadd.f32 %v187_v10, %v177_v0  ;;  %v499_v22 = vld [vmem:[%s794_s2 + $0xd8] sm:$0xff] }
  0xb4   :  { %v199_v31 = vadd.f32 %v198_v6, %v188_v23  ;;  %v298_v35 = vadd.f32 %v297_v17, %v287_v26 }
  0xb5   :  { %v207_v38 = vpop.permute.xlu1 %206  ;;  %v394_v39 = vpop.permute.xlu0 %393 }
  0xb6   :  { %v209_v24 = vmul.f32 %v479_v8, %v207_v38  ;;  %v396_v45 = vmul.f32 %v513_v9, %v394_v39  ;;  %v463_v39 = vld [vmem:[%s794_s2 + $0x48] sm:$0xff] }
  0xb7   :  { %v121_v55 = vmul.f32 %v463_v39, %v662_v47 }
  0xb8   :  { %v210_v40 = vadd.f32 %v209_v24, %v199_v31  ;;  %v397_v41 = vadd.f32 %v396_v45, %v386_v30 }
  0xb9   :  { %v405_v62 = vpop.permute.xlu1 %404  ;;  %v306_v63 = vpop.permute.xlu0 %305 }
  0xba   :  { %v308_v27 = vmul.f32 %v497_v13, %v306_v63  ;;  %v407_v32 = vmul.f32 %v515_v18, %v405_v62  ;;  %v122_v62 = vadd.f32 %v121_v55, %v111_v50 }
  0xbc   :  { %v309_v49 = vadd.f32 %v308_v27, %v298_v35  ;;  %v408_v51 = vadd.f32 %v407_v32, %v397_v41 }
  0xbd   :  { %v317_v19 = vpop.permute.xlu1 %316  ;;  %v218_v20 = vpop.permute.xlu0 %217 }
  0xbe   :  { %v220_v33 = vmul.f32 %v481_v53, %v218_v20  ;;  %v319_v36 = vmul.f32 %v499_v22, %v317_v19 }
  0xc0   :  { %v221_v52 = vadd.f32 %v220_v33, %v210_v40  ;;  %v320_v56 = vadd.f32 %v319_v36, %v309_v49 }
  0xc1   :  { %v229_v37 = vpop.permute.xlu1 %228  ;;  %v416_v38 = vpop.permute.xlu0 %415 }
  0xc2   :  { %v231_v42 = vmul.f32 %v483_v28, %v229_v37  ;;  %v418_v44 = vmul.f32 %v517_v29, %v416_v38 }
  0xc4   :  { %v232_v58 = vadd.f32 %v231_v42, %v221_v52  ;;  %v419_v59 = vadd.f32 %v418_v44, %v408_v51 }
  0xc5   :  { %v427_v57 = vpop.permute.xlu1 %426  ;;  %v328_v54 = vpop.permute.xlu0 %327 }
  0xc6   :  { %v429_v60 = vmul.f32 %v519_v43, %v427_v57  ;;  %v330_v61 = vmul.f32 %v501_v48, %v328_v54  ;;  %v431_v0 = vadd.f32 %v232_v58, %v122_v62 }
  0xc8   :  { %v430_v63 = vadd.f32 %v429_v60, %v419_v59  ;;  %v331_v46 = vadd.f32 %v330_v61, %v320_v56 }
  0xca   :  { %v432_v1 = vadd.f32 %v430_v63, %v331_v46 }
  0xcc   :  { %v433_v2 = vadd.f32 %v432_v1, %v431_v0 }
  0xce   :  { %v435_v3 = vrot.slane %v433_v2, 4 }
  0xd0   :  { %v437_v5 = vadd.f32 %v435_v3, %v433_v2 }
  0xd2   :  { %v440_v47 = vadd.f32 %v439_v4, %v437_v5 }
  0xd4   :  { %441 = vst [vmem:[%s796_s3] sm:$0xf] %v440_v47 }

</bundles_post_ra>
